<compile_context>
chip_gen: v6e
topology: v6e:2x2x1
jax: 0.10.0
libtpu: 0.0.40
codegen_flags: <defaults>
</compile_context>

<pallas_src>
import functools
import numpy as np
import jax
import jax.numpy as jnp
from jax import lax
from jax.experimental import pallas as pl
from jax.experimental.pallas import tpu as pltpu


# ----------------------------------------------------------------------------
# Taps
# ----------------------------------------------------------------------------
def _separable_taps(kernel=(1, 2, 1), normalize=True, flip=False):
    """1-D factor of the 2-D blur kernel built by BlurLayer.

    The module builds K = outer(k, k) (optionally / sum(K), optionally flipped).
    outer(k, k) / sum == outer(k/sum(k), k/sum(k)) and flip(K) == outer(flip(k),
    flip(k)), so a single flipped/normalized 1-D factor is exact.
    """
    k1 = np.asarray(kernel, dtype=np.float64)
    if flip:
        k1 = k1[::-1]
    if normalize:
        k1 = k1 / k1.sum()
    return tuple(float(v) for v in k1)


# ----------------------------------------------------------------------------
# Kernel bodies
# ----------------------------------------------------------------------------
def _blur_block_math(xf, topf, botf, kv, kh):
    """Blur one (bnc, bh, W) f32 block.

    topf / botf: the rows just above / below the block ((bnc,1,W) arrays or
    scalar 0.0), already zeroed when they fall outside the image.
    Shifts use pltpu.roll (XLU) + iota masks; nothing is concatenated.
    """
    kv0, kv1, kv2 = kv
    kh0, kh1, kh2 = kh
    bnc, bh, W = xf.shape

    # --- vertical (H / sublane) pass ---
    h_idx = lax.broadcasted_iota(jnp.int32, xf.shape, 1)
    x_up = pltpu.roll(xf, shift=1, axis=1)          # x_up[h] = x[h-1] (wraps)
    x_up = jnp.where(h_idx == 0, topf, x_up)        # row 0 <- halo / zero pad
    x_dn = pltpu.roll(xf, shift=bh - 1, axis=1)     # x_dn[h] = x[h+1] (wraps)
    x_dn = jnp.where(h_idx == bh - 1, botf, x_dn)   # last row <- halo / zero
    t = kv0 * x_up + kv1 * xf + kv2 * x_dn

    # --- horizontal (W / lane) pass: W is never tiled, so zero halo in-block ---
    w_idx = lax.broadcasted_iota(jnp.int32, xf.shape, 2)
    t_l = pltpu.roll(t, shift=1, axis=2)
    t_l = jnp.where(w_idx == 0, 0.0, t_l)
    t_r = pltpu.roll(t, shift=W - 1, axis=2)
    t_r = jnp.where(w_idx == W - 1, 0.0, t_r)
    return kh0 * t_l + kh1 * t + kh2 * t_r


def _make_kernel_full_h(kv, kh):
    """Each block holds full H rows -> the zero halo is entirely in-block."""
    def kernel(x_ref, o_ref):
        xf = x_ref[...].astype(jnp.float32)
        y = _blur_block_math(xf, 0.0, 0.0, kv, kh)
        o_ref[...] = y.astype(o_ref.dtype)
    return kernel


def _make_kernel_tiled_h(kv, kh):
    """H is tiled; one real halo row above/below arrives as an 8-row strip."""
    def kernel(x_ref, top_ref, bot_ref, o_ref):
        j = pl.program_id(1)
        nh = pl.num_programs(1)
        xf = x_ref[...].astype(jnp.float32)
        top = top_ref[:, 7:8, :].astype(jnp.float32)   # row j*bh - 1
        bot = bot_ref[:, 0:1, :].astype(jnp.float32)   # row (j+1)*bh
        # Gate halos that fall outside the image (clamped index maps).
        top = top * jnp.where(j > 0, 1.0, 0.0)
        bot = bot * jnp.where(j < nh - 1, 1.0, 0.0)
        y = _blur_block_math(xf, top, bot, kv, kh)
        o_ref[...] = y.astype(o_ref.dtype)
    return kernel


# ----------------------------------------------------------------------------
# Block picking (VMEM-budget + pipelining aware)
# ----------------------------------------------------------------------------
def _pick_blocks(nc, h, w, itemsize, budget_bytes=8 << 20, target_steps=8,
                 min_block_bytes=1 << 20):
    """Pick (bnc, bh) for (bnc, bh, W) blocks of a (NC, H, W) array.

    per_elem counts double-buffered input + output blocks AND ~4 live f32
    temporaries inside the kernel, so the budget is honest about what actually
    sits in VMEM (conservative enough for v7x's 64 MiB physical VMEM).
    """
    per_elem = 4 * itemsize + 16
    max_block_elems = max(8 * w, budget_bytes // per_elem)
    min_block_elems = max(1, min_block_bytes // per_elem)
    plane = h * w

    divs = [d for d in range(1, nc + 1) if nc % d == 0]

    if plane <= max_block_elems:
        # Whole (bnc, H, W) planes per block; tile only the channel axis.
        fit = [d for d in divs if d * plane <= max_block_elems]
        big = [d for d in fit if d * plane >= min_block_elems]
        if big:
            # Largest block that still exposes >= target_steps grid steps
            # (pipelining + v7x dual-TC); else max steps with full-size blocks.
            hit = [d for d in big if nc // d >= target_steps]
            bnc = max(hit) if hit else min(big)
        else:
            # Tiny problem: just split enough for pipelining / megacore.
            want = min(4, nc)
            hit = [d for d in fit if nc // d >= want]
            bnc = max(hit) if hit else fit[-1]
        return bnc, h

    # A single (1, H, W) plane exceeds the budget: bnc = 1 and tile H in
    # 8-row-aligned chunks (needs H % 8 == 0 for clean halo strips).
    if h % 8 != 0 or h < 16:
        return 1, h     # rare fallback; rely on the vmem_limit request
    max_rows = max(8, (max_block_elems // w) // 8 * 8)
    bh = 8
    for cand in range(8, h + 1, 8):
        if h % cand == 0 and cand <= max_rows:
            bh = cand
    return 1, bh


# ----------------------------------------------------------------------------
# Wrapper
# ----------------------------------------------------------------------------
def blur_layer(x, kernel=(1, 2, 1), normalize=True, flip=False,
               block_nc=None, block_h=None):
    """x: (N, C, H, W). Returns (N, C, H, W), matching BlurLayer.forward."""
    N, C, H, W = x.shape
    NC = N * C
    taps = _separable_taps(kernel, normalize, flip)

    # Native layout: merge (N, C) -> NC. Pure metadata reshape, no HBM traffic.
    x2 = x.reshape(NC, H, W)

    bnc, bh = _pick_blocks(NC, H, W, x.dtype.itemsize)
    if block_nc is not None:
        bnc = block_nc
    if block_h is not None:
        bh = block_h
    assert NC % bnc == 0, "block_nc must divide N*C"
    assert H % bh == 0 and (bh == H or bh % 8 == 0), \
        "block_h must divide H and be a multiple of 8 (or equal H)"

    n_nc = NC // bnc
    n_h = H // bh
    vmem_limit = 32 << 20   # > v5e/v6e defaults, well under v7x 64 MiB physical

    if n_h == 1:
        out2 = pl.pallas_call(
            _make_kernel_full_h(taps, taps),
            out_shape=jax.ShapeDtypeStruct((NC, H, W), x.dtype),
            grid_spec=pltpu.PrefetchScalarGridSpec(
                num_scalar_prefetch=0,
                grid=(n_nc,),
                in_specs=[pl.BlockSpec((bnc, H, W), lambda i: (i, 0, 0))],
                out_specs=pl.BlockSpec((bnc, H, W), lambda i: (i, 0, 0)),
            ),
            compiler_params=pltpu.CompilerParams(
                dimension_semantics=("parallel",),
                vmem_limit_bytes=vmem_limit,
            ),
        )(x2)
    else:
        hb8 = bh // 8
        nhb8 = H // 8
        out2 = pl.pallas_call(
            _make_kernel_tiled_h(taps, taps),
            out_shape=jax.ShapeDtypeStruct((NC, H, W), x.dtype),
            grid_spec=pltpu.PrefetchScalarGridSpec(
                num_scalar_prefetch=0,
                grid=(n_nc, n_h),
                in_specs=[
                    # main tile: rows [j*bh, (j+1)*bh)
                    pl.BlockSpec((bnc, bh, W), lambda i, j: (i, j, 0)),
                    # 8-row strip whose last row is j*bh - 1 (clamped at j=0)
                    pl.BlockSpec((bnc, 8, W),
                                 lambda i, j: (i, jnp.maximum(j * hb8 - 1, 0), 0)),
                    # 8-row strip whose first row is (j+1)*bh (clamped at last j)
                    pl.BlockSpec((bnc, 8, W),
                                 lambda i, j: (i, jnp.minimum((j + 1) * hb8, nhb8 - 1), 0)),
                ],
                out_specs=pl.BlockSpec((bnc, bh, W), lambda i, j: (i, j, 0)),
            ),
            compiler_params=pltpu.CompilerParams(
                dimension_semantics=("parallel", "parallel"),
                vmem_limit_bytes=vmem_limit,
            ),
        )(x2, x2, x2)

    return out2.reshape(N, C, H, W)


# ----------------------------------------------------------------------------
# Pure-JAX reference (mirrors the PyTorch module exactly)
# ----------------------------------------------------------------------------
def _reference_blur(x, kernel=(1, 2, 1), normalize=True, flip=False):
    k = np.array(kernel, dtype=np.float32).reshape(1, 3)
    k = k.T.dot(k)
    if normalize:
        k /= np.sum(k)
    if flip:
        k = k[::-1, ::-1]
    N, C, H, W = x.shape
    xp = jnp.pad(x, ((0, 0), (0, 0), (1, 1), (1, 1)))
    acc = jnp.zeros(x.shape, jnp.float32)
    for dh in range(3):
        for dw in range(3):
            acc = acc + float(k[dh, dw]) * xp[:, :, dh:dh + H, dw:dw + W].astype(jnp.float32)
    return acc.astype(x.dtype)


if __name__ == "__main__":
    key = jax.random.PRNGKey(0)
    k1, k2, k3 = jax.random.split(key, 3)

    # 1) Default path: native (N*C, H, W) tiling, halo handled in-block.
    x1 = jax.random.normal(k1, (2, 4, 16, 16), dtype=jnp.float32)
    f1 = jax.jit(functools.partial(blur_layer, kernel=(1, 2, 1),
                                   normalize=True, flip=False))
    y1 = jax.block_until_ready(f1(x1))
    np.testing.assert_allclose(np.asarray(y1), np.asarray(_reference_blur(x1)),
                               rtol=1e-5, atol=1e-5)

    # 2) H-tiled path with real cross-block halos (forced small block_h).
    x2 = jax.random.normal(k2, (1, 8, 32, 32), dtype=jnp.float32)
    f2 = jax.jit(functools.partial(blur_layer, block_nc=2, block_h=8))
    y2 = jax.block_until_ready(f2(x2))
    np.testing.assert_allclose(np.asarray(y2), np.asarray(_reference_blur(x2)),
                               rtol=1e-5, atol=1e-5)

    # 3) Non-default taps + flip (exercises normalize/flip handling).
    x3 = jax.random.normal(k3, (2, 3, 16, 16), dtype=jnp.float32)
    f3 = jax.jit(functools.partial(blur_layer, kernel=(1, 3, 2),
                                   normalize=True, flip=True))
    y3 = jax.block_until_ready(f3(x3))
    np.testing.assert_allclose(
        np.asarray(y3),
        np.asarray(_reference_blur(x3, kernel=(1, 3, 2), normalize=True, flip=True)),
        rtol=1e-5, atol=1e-5)

    print("KERNEL_OK")
</pallas_src>

<mosaic_0001>
module attributes {stable_mosaic.version = 11 : i64} {
  func.func @kernel(%arg0: i32, %arg1: memref<2x16x16xf32, #tpu.memory_space<vmem>>, %arg2: memref<2x16x16xf32, #tpu.memory_space<vmem>>) attributes {dimension_semantics = [#tpu.dimension_semantics<parallel>], iteration_bounds = array<i64: 4>, scalar_prefetch = 0 : i64, scratch_operands = 0 : i64, tpu.core_type = #tpu.core_type<tc>, window_params = [{transform_indices = @transform_0, window_bounds = array<i64: 2, 16, 16>}, {transform_indices = @transform_1, window_bounds = array<i64: 2, 16, 16>}]} {
    %c0 = arith.constant 0 : index
    %c0_0 = arith.constant 0 : index
    %c0_1 = arith.constant 0 : index
    %0 = vector.load %arg1[%c0, %c0_0, %c0_1] : memref<2x16x16xf32, #tpu.memory_space<vmem>>, vector<2x16x16xf32>
    %1 = tpu.iota {dimensions = array<i32: 1>} : vector<2x16x16xi32>
    %c1_i32 = arith.constant 1 : i32
    %2 = tpu.dynamic_rotate %0 by %c1_i32 dim 1 : vector<2x16x16xf32>, i32 -> vector<2x16x16xf32>
    %c0_i32 = arith.constant 0 : i32
    %3 = vector.broadcast %c0_i32 : i32 to vector<2x16x16xi32>
    %4 = arith.cmpi eq, %1, %3 : vector<2x16x16xi32>
    %cst = arith.constant 0.000000e+00 : f32
    %5 = vector.broadcast %cst : f32 to vector<2x16x16xf32>
    %6 = arith.select %4, %5, %2 : vector<2x16x16xi1>, vector<2x16x16xf32>
    %c15_i32 = arith.constant 15 : i32
    %7 = tpu.dynamic_rotate %0 by %c15_i32 dim 1 : vector<2x16x16xf32>, i32 -> vector<2x16x16xf32>
    %c15_i32_2 = arith.constant 15 : i32
    %8 = vector.broadcast %c15_i32_2 : i32 to vector<2x16x16xi32>
    %9 = arith.cmpi eq, %1, %8 : vector<2x16x16xi32>
    %cst_3 = arith.constant 0.000000e+00 : f32
    %10 = vector.broadcast %cst_3 : f32 to vector<2x16x16xf32>
    %11 = arith.select %9, %10, %7 : vector<2x16x16xi1>, vector<2x16x16xf32>
    %cst_4 = arith.constant 2.500000e-01 : f32
    %12 = vector.broadcast %cst_4 : f32 to vector<2x16x16xf32>
    %13 = arith.mulf %12, %6 : vector<2x16x16xf32>
    %cst_5 = arith.constant 5.000000e-01 : f32
    %14 = vector.broadcast %cst_5 : f32 to vector<2x16x16xf32>
    %15 = arith.mulf %14, %0 : vector<2x16x16xf32>
    %16 = arith.addf %13, %15 : vector<2x16x16xf32>
    %cst_6 = arith.constant 2.500000e-01 : f32
    %17 = vector.broadcast %cst_6 : f32 to vector<2x16x16xf32>
    %18 = arith.mulf %17, %11 : vector<2x16x16xf32>
    %19 = arith.addf %16, %18 : vector<2x16x16xf32>
    %20 = tpu.iota {dimensions = array<i32: 2>} : vector<2x16x16xi32>
    %c1_i32_7 = arith.constant 1 : i32
    %21 = tpu.dynamic_rotate %19 by %c1_i32_7 dim 2 : vector<2x16x16xf32>, i32 -> vector<2x16x16xf32>
    %c0_i32_8 = arith.constant 0 : i32
    %22 = vector.broadcast %c0_i32_8 : i32 to vector<2x16x16xi32>
    %23 = arith.cmpi eq, %20, %22 : vector<2x16x16xi32>
    %cst_9 = arith.constant 0.000000e+00 : f32
    %24 = vector.broadcast %cst_9 : f32 to vector<2x16x16xf32>
    %25 = arith.select %23, %24, %21 : vector<2x16x16xi1>, vector<2x16x16xf32>
    %c15_i32_10 = arith.constant 15 : i32
    %26 = tpu.dynamic_rotate %19 by %c15_i32_10 dim 2 : vector<2x16x16xf32>, i32 -> vector<2x16x16xf32>
    %c15_i32_11 = arith.constant 15 : i32
    %27 = vector.broadcast %c15_i32_11 : i32 to vector<2x16x16xi32>
    %28 = arith.cmpi eq, %20, %27 : vector<2x16x16xi32>
    %cst_12 = arith.constant 0.000000e+00 : f32
    %29 = vector.broadcast %cst_12 : f32 to vector<2x16x16xf32>
    %30 = arith.select %28, %29, %26 : vector<2x16x16xi1>, vector<2x16x16xf32>
    %cst_13 = arith.constant 2.500000e-01 : f32
    %31 = vector.broadcast %cst_13 : f32 to vector<2x16x16xf32>
    %32 = arith.mulf %31, %25 : vector<2x16x16xf32>
    %cst_14 = arith.constant 5.000000e-01 : f32
    %33 = vector.broadcast %cst_14 : f32 to vector<2x16x16xf32>
    %34 = arith.mulf %33, %19 : vector<2x16x16xf32>
    %35 = arith.addf %32, %34 : vector<2x16x16xf32>
    %cst_15 = arith.constant 2.500000e-01 : f32
    %36 = vector.broadcast %cst_15 : f32 to vector<2x16x16xf32>
    %37 = arith.mulf %36, %30 : vector<2x16x16xf32>
    %38 = arith.addf %35, %37 : vector<2x16x16xf32>
    %c0_16 = arith.constant 0 : index
    %c0_17 = arith.constant 0 : index
    %c0_18 = arith.constant 0 : index
    %39 = vector.load %arg2[%c0_16, %c0_17, %c0_18] : memref<2x16x16xf32, #tpu.memory_space<vmem>>, vector<2x16x16xf32>
    tpu.vector_store %arg2[%c0_16, %c0_17, %c0_18], %38 {strides = array<i32>} : memref<2x16x16xf32, #tpu.memory_space<vmem>>, vector<2x16x16xf32>,
    return
  }
  func.func @transform_0(%arg0: i32) -> (i32, i32, i32) {
    %c0_i32 = arith.constant 0 : i32
    %c0_i32_0 = arith.constant 0 : i32
    %c0_i32_1 = arith.constant 0 : i32
    return %arg0, %c0_i32, %c0_i32_0 : i32, i32, i32
  }
  func.func @transform_1(%arg0: i32) -> (i32, i32, i32) {
    %c0_i32 = arith.constant 0 : i32
    %c0_i32_0 = arith.constant 0 : i32
    %c0_i32_1 = arith.constant 0 : i32
    return %arg0, %c0_i32, %c0_i32_0 : i32, i32, i32
  }
}

</mosaic_0001>

<bundles_post_ra>
// kernel: blur_layer.1
= control target key start
LH: loop header
LB: loop body
LE: loop exit
PB: predicated region body
PF: predicated region fallthrough
CT: control target
= control target key end

     0   :  { %6 = vsyncpa [#allocation3], 0  ;;  %s749_s0 = inlined_call_operand.hbm [shape: f32[8,16,16], index: 0, kind: input, shape index: {}]   ;;  %s750_s1 = inlined_call_operand.hbm [shape: f32[8,16,16], index: 1, kind: output, shape index: {}]  }
   0x1   :  { %8 = vsyncpa [#allocation3 + $0x1], 0 }
   0x2   :  { %9 = vsyncpa [#allocation4], 0 }
   0x3   :  { %11 = vsyncpa [#allocation4 + $0x1], 0  ;;  %s559_s6 = smov 0   ;;  %s561_s7 = smov 0  }
   0x4   :  { %s563_s8 = smov 0   ;;  %s565_s9 = smov 0  }
   0x5 LB: > { %s580_s10 = sadd.s32 4294967295, %s538_s9   ;;  %s373_s11 = sadd.s32 4294967294, %s538_s9   ;;  %s538_s9 = sphi %s565_s9, %s764_s9   ;;  %s534_s8 = sphi %s563_s8, %s763_s8   ;;  %s530_s7 = sphi %s561_s7, %s762_s7   ;;  %s526_s6 = sphi %s559_s6, %s761_s6  }
   0x6   : > { %s584_s12 = sadd.s32 1, %s538_s9   ;;  %s24_s13 = sadd.s32 1, %s534_s8 }
   0x7   : > { %s21_s14 = ssub.s32 %s538_s9, %s584_s12  ;;  %p31_p0 = scmp.ne.s32.totalorder %s534_s8, %s530_s7 }
   0x8   : > { %p22_p1 = scmp.eq.s32.totalorder %s21_s14, 0  ;;  %p32_p2 = scmp.eq.s32.totalorder %s538_s9, 0 }
   0x9   : > { %p37_p3 = scmp.ne.s32.totalorder %s530_s7, %s526_s6  ;;  %p38_p4 = scmp.eq.s32.totalorder %s580_s10, 0 }
   0xa   : > { %s596_s15 = scalar_select %p22_p1, %s534_s8, %s24_s13  }
   0xb   : > { %p598_p5 = por %p32_p2, %p31_p0  ;;  %p602_p6 = por %p38_p4, %p37_p3 }
   0xc   : > { %p61_p7 = scmp.eq.s32.totalorder %s580_s10, 3  ;;  %p67_p8 = scmp.eq.s32.totalorder %s373_s11, 3 }
   0xd   : > { %s754_s17 = scalar_select %p602_p6, 1, 0 }
   0xe   : > { %p405_p9 = scmp.lt.s32.totalorder %s538_s9, 4  ;;  %p608_p10 = por %p61_p7, %p31_p0 }
   0xf   : > { %p612_p11 = por %p67_p8, %p37_p3  ;;  %s87_s20 = sand.u32 1, %s534_s8  }
  0x10   : > { %s755_s18 = scalar_select %p608_p10, 1, 0 }
  0x11   : > { %s756_s19 = scalar_select %p612_p11, 1, 0 }
  0x12   : > { %s390_s21 = sshll.u32 %s538_s9, 9  ;;  %s376_s22 = sshll.u32 %s87_s20, 5 }
  0x13   : > { %s621_s25 = scalar_lea.hbm %s749_s0, %s390_s21  ;;  %s91_s26 = scalar_lea.vmem [#allocation2], %s376_s22 }
  0x14   : > { %s99_s27 = sshll.u32 %s91_s26, 4  ;;  %p625_p12 = pnand %p405_p9, %p598_p5  ;;  %s629_s27 = int_to_ptr.vmem [resolvable:$true] %s99_s27 }
  0x15   : > { %s631_s29 = scalar_lea.sflag [#allocation3], %s87_s20  ;;  %s446_s30 = scalar_lea.hbm %s621_s25, 512 }
  0x16   : > { %p447_p13 = scmp.ne.s32.totalorder %s621_s25, %s446_s30  ;;  %p448_p0 = pneg %p625_p12 }
  0x17   : > { %s451_s4 = scalar_lea.hbm %s749_s0, 2048  ;;  %p452_p3 = scmp.lt.s32.totalorder %s621_s25, %s749_s0 }
  0x18   : > { %p449_p1 = pnand %p448_p0, %p447_p13  ;;  %p453_p4 = scmp.lt.s32.totalorder %s451_s4, %s446_s30 }
  0x1a   : > { %p450_p2 = pneg %p449_p1  ;;  %p454_p5 = por %p453_p4, %p452_p3 }
  0x1c   : > { %p455_p7 = pnand %p454_p5, %p450_p2 }
  0x1e   : > { %458 = shalt.err (!%p455_p7)
}
  0x1f   : > { %s459_s13 = scalar_lea.vmem %s629_s27, 512  ;;  %s540_s14 = smov [#allocation2]  }
  0x20   : > { %p460_p8 = scmp.ne.s32.totalorder %s629_s27, %s459_s13  ;;  %s464_s16 = sshll.u32 %s540_s14, 4  ;;  %s465_s16 = int_to_ptr.vmem [resolvable:$false] %s464_s16 }
  0x21   : > { %s466_s20 = scalar_lea.vmem %s465_s16, 1024  ;;  %p467_p1 = scmp.lt.s32.totalorder %s629_s27, %s465_s16 }
  0x22   : > { %p462_p9 = pnand %p460_p8, %p448_p0  ;;  %p468_p11 = scmp.lt.s32.totalorder %s466_s20, %s459_s13 }
  0x24   : > { %p463_p13 = pneg %p462_p9  ;;  %p469_p10 = por %p468_p11, %p467_p1 }
  0x26   : > { %p470_p6 = pnand %p469_p10, %p463_p13 }
  0x28   : > { %473 = shalt.err (!%p470_p6)
}
  0x29   : > { %s541_s21 = smov 128   ;;  %s542_s22 = smov 8  }
  0x2a   : > { %400 = dma.hbm_to_vmem [thread:$0]  (!%p625_p12), %s621_s25, 512, %s629_s27, %s631_s29, %s541_s21, %s541_s21, %s542_s22  }
  0x2b   : > { %p380_p0 = scmp.ge.s32.totalorder %s538_s9, 1  ;;  %p107_p2 = scmp.lt.s32.totalorder %s538_s9, 5 }
  0x2d   : > { %p108_p3 = pnand %p380_p0, %p107_p2 }
  0x2e   : > { %s655_s23 = sand.u32 (!%p108_p3), 1, %s530_s7   ;;  %p758_p6 = scmp.ne.s32.totalorder (!%p108_p3), %s754_s17, 0 }
  0x2f   : > { %111 = sbr.rel (%p108_p3) target bundleno = 448 (0x1c0), region = 24  ;;  %s381_s24 = sshll.u32 (!%p108_p3), %s655_s23, 5 }
  0x30   : > { %s114_s26 = scalar_lea.sflag (!%p108_p3), [#allocation3], %s655_s23  ;;  %s117_s30 = scalar_lea.vmem (!%p108_p3), [#allocation2], %s381_s24 }
  0x34   : > { %517 = dma.done.wait (%p758_p6), %s114_s26, 512  }
  0x35   : > { %519 = vsyncadd (%p758_p6), %s114_s26, 4294966784  ;;  %v142_v0 = vlaneseq  ;;  %v138_v3 = vld [vmem:[%s117_s30] sm:$0xff]  ;;  %v139_v4 = vld [vmem:[%s117_s30 + $0x8] sm:$0xff]  ;;  %s543_s17 = smov 16   ;;  %vm197_vm4 = vcmask 1047680   ;;  %s544_s25 = smov 113  }
  0x36   : > { %v140_v5 = vld [vmem:[%s117_s30 + $0x10] sm:$0xff]  ;;  %v145_v6 = vrot.slane %v138_v3, 7  ;;  %v147_v7 = vrot.slane %v139_v4, 7  ;;  %v160_v8 = vrot.slane %v138_v3, 1  ;;  %v162_v9 = vrot.slane %v139_v4, 1  ;;  %v141_v10 = vld [vmem:[%s117_s30 + $0x18] sm:$0xff] }
  0x37   : > { %v143_v1 = vshrl.u32 %v142_v0, 7  ;;  %v179_v11 = vmul.f32 0.5, %v138_v3  ;;  %v146_v12 = vrot.slane %v140_v5, 7  ;;  %v148_v13 = vrot.slane %v141_v10, 7  ;;  %s545_s27 = smov 127   ;;  %s135_s28 = scalar_lea.vmem [#allocation5], %s381_s24 }
  0x38   : > { %v161_v14 = vrot.slane %v140_v5, 1  ;;  %v163_v17 = vrot.slane %v141_v10, 1  ;;  %v181_v18 = vmul.f32 0.5, %v140_v5  ;;  %v180_v32 = vmul.f32 0.5, %v139_v4  ;;  %s300_s29 = sshll.u32 %s135_s28, 4  ;;  %s392_s2 = sshll.u32 %s580_s10, 9  ;;  %s699_s29 = int_to_ptr.vmem [resolvable:$true] %s300_s29 }
  0x39   : > { %v144_v2 = vadd.s32 8, %v143_v1  ;;  %vm149_vm0 = vcmp.lt.s32.totalorder %v143_v1, 1  ;;  %vm154_vm1 = vcmp.eq.s32.totalorder %v143_v1, 0  ;;  %vm164_vm2 = vcmp.lt.s32.totalorder %v143_v1, 7  ;;  %s706_s5 = scalar_lea.hbm %s750_s1, %s392_s2  ;;  %s286_s10 = scalar_lea.sflag [#allocation4], %s655_s23 }
  0x3a   : > { %v152_v15 = vsel %vm149_vm0, %v147_v7, %v145_v6  ;;  %v165_v16 = vsel %vm164_vm2, %v160_v8, %v162_v9  ;;  %v153_v21 = vsel %vm149_vm0, %v148_v13, %v146_v12  ;;  %v150_v22 = vsel %vm149_vm0, %v145_v6, %v147_v7  ;;  %s474_s11 = scalar_lea.vmem %s699_s29, 512  ;;  %p759_p11 = scmp.ne.s32.totalorder %s755_s18, 0 }
  0x3b   : > { %vm170_vm3 = vcmp.eq.s32.totalorder %v144_v2, 15  ;;  %v156_v19 = vsel %vm154_vm1, 0.0, %v152_v15  ;;  %v187_v20 = vmul.f32 0.25, %v165_v16  ;;  %v158_v24 = vsel %vm154_vm1, 0.0, %v153_v21  ;;  %p475_p10 = scmp.ne.s32.totalorder %s699_s29, %s474_s11  ;;  %s546_s13 = smov [#allocation5]  }
  0x3c   : > { %v175_v23 = vmul.f32 0.25, %v156_v19  ;;  %v166_v25 = vsel %vm164_vm2, %v161_v14, %v163_v17  ;;  %v167_v26 = vsel %vm164_vm2, %v162_v9, %v160_v8  ;;  %v177_v27 = vmul.f32 0.25, %v158_v24  ;;  %s478_s14 = sshll.u32 %s546_s13, 4  ;;  %s479_s14 = int_to_ptr.vmem [resolvable:$false] %s478_s14 }
  0x3d   : > { %v189_v28 = vmul.f32 0.25, %v166_v25  ;;  %v172_v29 = vsel %vm170_vm3, 0.0, %v167_v26  ;;  %v176_v30 = vmul.f32 0.25, %v150_v22  ;;  %v151_v34 = vsel %vm149_vm0, %v146_v12, %v148_v13  ;;  %p476_p12 = pnand %p475_p10, %p759_p11  ;;  %s480_s16 = scalar_lea.vmem %s479_s14, 1024 }
  0x3e   : > { %v183_v31 = vadd.f32 %v179_v11, %v175_v23  ;;  %v188_v33 = vmul.f32 0.25, %v172_v29  ;;  %v185_v35 = vadd.f32 %v181_v18, %v177_v27  ;;  %v168_v36 = vsel %vm164_vm2, %v163_v17, %v161_v14  ;;  %p481_p5 = scmp.lt.s32.totalorder %s699_s29, %s479_s14  ;;  %p482_p7 = scmp.lt.s32.totalorder %s480_s16, %s474_s11 }
  0x3f   : > { %v178_v37 = vmul.f32 0.25, %v151_v34  ;;  %v182_v38 = vmul.f32 0.5, %v141_v10  ;;  %v184_v40 = vadd.f32 %v180_v32, %v176_v30  ;;  %v174_v41 = vsel %vm170_vm3, 0.0, %v168_v36  ;;  %p477_p4 = pneg %p476_p12 }
  0x40   : > { %v191_v39 = vadd.f32 %v187_v20, %v183_v31  ;;  %v193_v42 = vadd.f32 %v189_v28, %v185_v35  ;;  %v190_v44 = vmul.f32 0.25, %v174_v41  ;;  %v196_v63 = vand.u32 127, %v142_v0  ;;  %p483_p8 = por %p482_p7, %p481_p5 }
  0x41   : > { %v186_v43 = vadd.f32 %v182_v38, %v178_v37  ;;  %v192_v45 = vadd.f32 %v188_v33, %v184_v40  ;;  %vm280_vm7 = vcmask 130048  }
  0x42   : > { %198 = vrot.lane.b32.xlu0 %v191_v39, %s543_s17  ;;  %204 = vrot.lane.b32.xlu1 %v193_v42, %s543_s17  ;;  %vm222_vm5 = vcmp.eq.s32.totalorder %v196_v63, 0  ;;  %v264_v5 = vmul.f32 0.5, %v191_v39  ;;  %vm243_vm6 = vcmp.eq.s32.totalorder %v196_v63, 15  ;;  %v266_v14 = vmul.f32 0.5, %v193_v42  ;;  %p484_p9 = pnand %p483_p8, %p477_p4 }
  0x43   : > { %v194_v46 = vadd.f32 %v190_v44, %v186_v43  ;;  %v265_v12 = vmul.f32 0.5, %v192_v45 }
  0x45   : > { %v267_v22 = vmul.f32 0.5, %v194_v46 }
  0x46   : > { %201 = vrot.lane.b32.xlu0 %v192_v45, %s543_s17  ;;  %207 = vrot.lane.b32.xlu1 %v194_v46, %s543_s17 }
  0xb4   : > { %v199_v47 = vpop.permute.xlu0 %198  ;;  %v205_v49 = vpop.permute.xlu1 %204 }
  0xb5   : > { %v200_v48 = vsel %vm197_vm4, %v199_v47, %v191_v39  ;;  %v206_v50 = vsel %vm197_vm4, %v205_v49, %v193_v42 }
  0xb6   : > { %210 = vrot.lane.b32.xlu0 %v200_v48, %s543_s17 }
  0xb8   : > { %v202_v51 = vpop.permute.xlu0 %201  ;;  %v208_v53 = vpop.permute.xlu1 %207 }
  0xb9   : > { %v203_v52 = vsel %vm197_vm4, %v202_v51, %v192_v45  ;;  %v209_v54 = vsel %vm197_vm4, %v208_v53, %v194_v46 }
  0xba   : > { %214 = vrot.lane.b32.xlu0 %v206_v50, %s543_s17  ;;  %212 = vrot.lane.b32.xlu1 %v203_v52, %s543_s17 }
  0xbe   : > { %216 = vrot.lane.b32.xlu1 %v209_v54, %s543_s17 }
 0x128   : > { %v211_v55 = vpop.permute.xlu0 %210 }
 0x129   : > { %v218_v56 = vsel %vm197_vm4, %v211_v55, %v191_v39 }
 0x12a   : > { %227 = vrot.lane.b32.xlu0 %v218_v56, %s544_s25 }
 0x12c   : > { %v213_v57 = vpop.permute.xlu1 %212  ;;  %v215_v58 = vpop.permute.xlu0 %214 }
 0x12d   : > { %v219_v59 = vsel %vm197_vm4, %v213_v57, %v192_v45  ;;  %v220_v60 = vsel %vm197_vm4, %v215_v58, %v193_v42 }
 0x12e   : > { %229 = vrot.lane.b32.xlu1 %v219_v59, %s544_s25  ;;  %231 = vrot.lane.b32.xlu0 %v220_v60, %s544_s25 }
 0x130   : > { %v217_v61 = vpop.permute.xlu1 %216 }
 0x131   : > { %v221_v62 = vsel %vm197_vm4, %v217_v61, %v194_v46 }
 0x132   : > { %233 = vrot.lane.b32.xlu1 %v221_v62, %s544_s25  ;;  %244 = vrot.lane.b32.xlu0 %v218_v56, %s545_s27 }
 0x136   : > { %246 = vrot.lane.b32.xlu1 %v219_v59, %s545_s27  ;;  %248 = vrot.lane.b32.xlu0 %v220_v60, %s545_s27 }
 0x13a   : > { %250 = vrot.lane.b32.xlu1 %v221_v62, %s545_s27 }
 0x19c   : > { %v228_v1 = vpop.permute.xlu0 %227 }
 0x19d   : > { %v239_v2 = vsel %vm222_vm5, 0.0, %v228_v1 }
 0x19e   : > { %v260_v6 = vmul.f32 0.25, %v239_v2 }
 0x1a0   : > { %v230_v3 = vpop.permute.xlu1 %229  ;;  %v232_v4 = vpop.permute.xlu0 %231  ;;  %v268_v0 = vadd.f32 %v264_v5, %v260_v6 }
 0x1a1   : > { %v240_v7 = vsel %vm222_vm5, 0.0, %v230_v3  ;;  %v241_v8 = vsel %vm222_vm5, 0.0, %v232_v4 }
 0x1a2   : > { %v261_v11 = vmul.f32 0.25, %v240_v7  ;;  %v262_v15 = vmul.f32 0.25, %v241_v8 }
 0x1a4   : > { %v234_v9 = vpop.permute.xlu1 %233  ;;  %v245_v10 = vpop.permute.xlu0 %244  ;;  %v269_v21 = vadd.f32 %v265_v12, %v261_v11  ;;  %v270_v25 = vadd.f32 %v266_v14, %v262_v15 }
 0x1a5   : > { %v256_v13 = vsel %vm243_vm6, 0.0, %v245_v10  ;;  %v242_v17 = vsel %vm222_vm5, 0.0, %v234_v9 }
 0x1a6   : > { %v272_v16 = vmul.f32 0.25, %v256_v13  ;;  %v263_v26 = vmul.f32 0.25, %v242_v17 }
 0x1a8   : > { %v276_v18 = vadd.f32 %v272_v16, %v268_v0  ;;  %v247_v19 = vpop.permute.xlu1 %246  ;;  %v249_v20 = vpop.permute.xlu0 %248  ;;  %v271_v33 = vadd.f32 %v267_v22, %v263_v26 }
 0x1a9   : > { %v257_v23 = vsel %vm243_vm6, 0.0, %v247_v19  ;;  %v258_v24 = vsel %vm243_vm6, 0.0, %v249_v20 }
 0x1aa   : > { %281 = vst.msk [vmem:[%s135_s28] sm:$0xff] %vm280_vm7, %v276_v18  ;;  %v273_v27 = vmul.f32 0.25, %v257_v23  ;;  %v274_v28 = vmul.f32 0.25, %v258_v24 }
 0x1ac   : > { %v277_v29 = vadd.f32 %v273_v27, %v269_v21  ;;  %v278_v30 = vadd.f32 %v274_v28, %v270_v25  ;;  %v251_v31 = vpop.permute.xlu1 %250 }
 0x1ad   : > { %v259_v32 = vsel %vm243_vm6, 0.0, %v251_v31 }
 0x1ae   : > { %282 = vst.msk [vmem:[%s135_s28 + $0x8] sm:$0xff] %vm280_vm7, %v277_v29  ;;  %283 = vst.msk [vmem:[%s135_s28 + $0x10] sm:$0xff] %vm280_vm7, %v278_v30  ;;  %v275_v34 = vmul.f32 0.25, %v259_v32 }
 0x1b0   : > { %v279_v35 = vadd.f32 %v275_v34, %v271_v33 }
 0x1b2   : > { %284 = vst.msk [vmem:[%s135_s28 + $0x18] sm:$0xff] %vm280_vm7, %v279_v35 }
 0x1b3   : > { %487 = shalt.err (!%p484_p9)
}
 0x1b4   : > { %s488_s20 = scalar_lea.hbm %s706_s5, 512  ;;  %s492_s24 = scalar_lea.hbm %s750_s1, 2048 }
 0x1b5   : > { %p489_p13 = scmp.ne.s32.totalorder %s706_s5, %s488_s20  ;;  %p493_p2 = scmp.lt.s32.totalorder %s706_s5, %s750_s1 }
 0x1b6   : > { %p494_p3 = scmp.lt.s32.totalorder %s492_s24, %s488_s20 }
 0x1b7   : > { %p490_p1 = pnand %p489_p13, %p759_p11 }
 0x1b8   : > { %p495_p6 = por %p494_p3, %p493_p2 }
 0x1b9   : > { %p491_p0 = pneg %p490_p1 }
 0x1bb   : > { %p496_p10 = pnand %p495_p6, %p491_p0 }
 0x1bd   : > { %499 = shalt.err (!%p496_p10)
}
 0x1be   : > { %s547_s17 = smov 128   ;;  %s548_s25 = smov 8  }
 0x1bf   : > { %395 = dma.vmem_to_hbm [thread:$0]  (%p759_p11), %s699_s29, 512, %s706_s5, %s286_s10, %s547_s17, %s547_s17, %s548_s25  }
 0x1c0 PF: > { %p406_p12 = scmp.ge.s32.totalorder %s538_s9, 2  ;;  %s315_s27 = sand.u32 1, %s526_s6  }
 0x1c1   : > { %p760_p4 = scmp.ne.s32.totalorder %s756_s19, 0  ;;  %s316_s28 = scalar_lea.sflag [#allocation4], %s315_s27 }
 0x1c3   : > { %p402_p5 = pnand %p406_p12, %p760_p4 }
 0x1c5   : > { %p403_p7 = pneg %p402_p5 }
 0x1c7   : > { %521 = dma.done.wait (%p403_p7), %s316_s28, 512  }
 0x1c8   : > { %523 = vsyncadd (%p403_p7), %s316_s28, 4294966784  ;;  %p14_p8 = scmp.ge.s32.totalorder %s584_s12, 6   ;;  %s761_s6 = smov %s530_s7 }
 0x1c9   : > { %s762_s7 = smov %s534_s8  ;;  %s763_s8 = smov %s596_s15 }
 0x1ca   : > { %s764_s9 = smov %s584_s12  ;;  %16 = sbr.rel (!%p14_p8) target bundleno = 5 (0x5), region = 69 }
 0x1cf   :  { %321 = vsyncpa [#allocation3], 1 }
 0x1d0   :  { %323 = vsyncpa [#allocation3 + $0x1], 1 }
 0x1d1   :  { %324 = vsyncpa [#allocation4], 1 }
 0x1d2   :  { %326 = vsyncpa [#allocation4 + $0x1], 1 }

</bundles_post_ra>
